<compile_context>
chip_gen: v6e
topology: v6e:2x2x1
jax: 0.10.0
libtpu: 0.0.40
codegen_flags: <defaults>
</compile_context>

<pallas_src>
import functools

import jax
import jax.numpy as jnp
from jax.experimental import pallas as pl
from jax.experimental.pallas import tpu as pltpu

_BN_EPS = 1e-5


def _lane_width(hidden, dim_action):
    return ((max(hidden, dim_action, 1) + 127) // 128) * 128


def _slab_layout(dim_state, hidden, dim_action, lanes):
    """Row offsets of every parameter inside the packed (rows, lanes) slab."""
    assert hidden <= lanes and dim_action <= lanes
    off = {}
    off["w2"] = 0                      # (lanes, lanes); [:hidden,:hidden] = w2, 8-aligned
    r = lanes
    if dim_action > 1:
        off["w3blk"] = r               # (lanes, lanes); [:hidden,:dim_action] = w3, 8-aligned
        r += lanes
    off["w1"] = r; r += dim_state      # (dim_state, lanes); lanes[:hidden] = w1
    off["gamma1"] = r; r += 1
    off["beta1"] = r; r += 1
    off["gamma2"] = r; r += 1
    off["beta2"] = r; r += 1
    if dim_action == 1:
        off["w3t"] = r; r += 1         # single row; lanes[:hidden] = w3[:, 0]
    off["b3"] = r; r += 1              # lanes[:dim_action] = b3
    rows = ((r + 7) // 8) * 8          # pad sublane dim to a multiple of 8
    return off, rows


def pack_actor_params(params, dim_state, hidden, dim_action):
    """Pack all parameters into one lane-aligned f32 slab (once per param update).

    lin1/lin2 biases are intentionally NOT packed: they cancel against the
    TRAIN-mode BatchNorm batch mean, so the kernel never needs them.  If the
    model is ever run in eval mode (running stats) this packing is invalid.
    """
    lanes = _lane_width(hidden, dim_action)
    off, rows = _slab_layout(dim_state, hidden, dim_action, lanes)
    slab = jnp.zeros((rows, lanes), jnp.float32)
    slab = slab.at[off["w2"]:off["w2"] + hidden, :hidden].set(params["w2"])
    if dim_action > 1:
        slab = slab.at[off["w3blk"]:off["w3blk"] + hidden, :dim_action].set(params["w3"])
    slab = slab.at[off["w1"]:off["w1"] + dim_state, :hidden].set(params["w1"])
    slab = slab.at[off["gamma1"], :hidden].set(params["gamma1"][0])
    slab = slab.at[off["beta1"], :hidden].set(params["beta1"][0])
    slab = slab.at[off["gamma2"], :hidden].set(params["gamma2"][0])
    slab = slab.at[off["beta2"], :hidden].set(params["beta2"][0])
    if dim_action == 1:
        slab = slab.at[off["w3t"], :hidden].set(params["w3"][:, 0])
    slab = slab.at[off["b3"], :dim_action].set(params["b3"][0])
    return slab


def actor_kernel(x_ref, slab_ref, scale_ref, o_ref, *, dim_state, hidden, dim_action):
    lanes = slab_ref.shape[1]
    batch = x_ref.shape[0]
    off, _ = _slab_layout(dim_state, hidden, dim_action, lanes)

    def bn_relu(h, gamma, beta):
        # Training-mode BN, single-pass stats: biased var = E[h^2] - mu^2,
        # clamped at 0 to guard against f32 cancellation drift before rsqrt.
        mu = jnp.mean(h, axis=0, keepdims=True)
        msq = jnp.mean(h * h, axis=0, keepdims=True)
        var = jnp.maximum(msq - mu * mu, 0.0)
        hn = (h - mu) * jax.lax.rsqrt(var + _BN_EPS) * gamma + beta
        return jnp.maximum(hn, 0.0)

    x = x_ref[...].astype(jnp.float32)                                    # (B, dim_state)

    # ---- lin1 (bias dropped: cancelled by BN batch mean) -> bn1 -> relu ----
    # TODO(synk): measure a broadcast-FMA alternative (sum_k x[:,k:k+1]*w1[k,:])
    # to skip the MXU push/pop latency for K=dim_state; keep the dot until a
    # bundle diff shows a net win (lane-broadcast of x columns costs XLU work).
    w1 = slab_ref[off["w1"]:off["w1"] + dim_state, :]                     # (dim_state, L)
    h1 = jnp.dot(x, w1, preferred_element_type=jnp.float32)               # (B, L), pad lanes 0
    h1 = bn_relu(h1,
                 slab_ref[off["gamma1"]:off["gamma1"] + 1, :],
                 slab_ref[off["beta1"]:off["beta1"] + 1, :])

    # ---- lin2 (bias dropped) -> bn2 -> relu ----
    # Contract over the full padded lane width; pad rows/cols of packed w2 are 0.
    w2 = slab_ref[off["w2"]:off["w2"] + lanes, :]                         # (L, L)
    h2 = jnp.dot(h1, w2, preferred_element_type=jnp.float32)              # (B, L)
    h2 = bn_relu(h2,
                 slab_ref[off["gamma2"]:off["gamma2"] + 1, :],
                 slab_ref[off["beta2"]:off["beta2"] + 1, :])

    # ---- lin3 -> tanh -> scale ----
    scale = scale_ref[0, 0]
    b3 = slab_ref[off["b3"]:off["b3"] + 1, :]                             # (1, L), pad lanes 0
    if dim_action == 1:
        # Tiny N: VPU multiply + XLU lane reduce, no MXU push for an N=1 matmul.
        w3row = slab_ref[off["w3t"]:off["w3t"] + 1, :]                    # (1, L)
        h3 = jnp.sum(h2 * w3row, axis=-1, keepdims=True) + b3[:, 0:1]     # (B, 1)
        act = jnp.tanh(h3) * scale
        # Lane-dense (unmasked) store; wrapper slices lane 0.
        o_ref[...] = jnp.broadcast_to(act, (batch, lanes)).astype(o_ref.dtype)
    else:
        # One MXU dot against the zero-padded (L, L) w3 block: pad columns give
        # tanh(0 + 0)*scale = 0, so the result is already a lane-dense slab.
        w3 = slab_ref[off["w3blk"]:off["w3blk"] + lanes, :]               # (L, L)
        h3 = jnp.dot(h2, w3, preferred_element_type=jnp.float32) + b3     # (B, L)
        o_ref[...] = (jnp.tanh(h3) * scale).astype(o_ref.dtype)


@functools.partial(jax.jit, static_argnames=("dim_state", "hidden", "dim_action"))
def actor_forward(state, slab, action_scaling, *, dim_state, hidden, dim_action):
    """state: (B, dim_state) f32, slab: packed params -> (B, dim_action) f32."""
    batch = state.shape[0]
    lanes = slab.shape[1]
    kernel = functools.partial(actor_kernel, dim_state=dim_state,
                               hidden=hidden, dim_action=dim_action)
    scale = jnp.asarray(action_scaling, jnp.float32).reshape(1, 1)

    # Advisory cost estimate so XLA can schedule around the custom call when it
    # is embedded in a larger (DDPG update) jit.
    n_out_cols = lanes if dim_action > 1 else 1
    cost = pl.CostEstimate(
        flops=2 * batch * lanes * (dim_state + lanes + n_out_cols) + 12 * batch * lanes,
        transcendentals=batch * dim_action + 2 * lanes,
        bytes_accessed=4 * (state.size + slab.size + batch * lanes),
    )

    out = pl.pallas_call(
        kernel,
        out_shape=jax.ShapeDtypeStruct((batch, lanes), jnp.float32),
        in_specs=[
            pl.BlockSpec(memory_space=pltpu.MemorySpace.VMEM),   # state
            pl.BlockSpec(memory_space=pltpu.MemorySpace.VMEM),   # packed params (1 DMA)
            pl.BlockSpec(memory_space=pltpu.MemorySpace.SMEM),   # action_scaling scalar
        ],
        out_specs=pl.BlockSpec(memory_space=pltpu.MemorySpace.VMEM),
        cost_estimate=cost,
    )(state, slab, scale)
    return out[:, :dim_action]


def _reference_forward(state, params, action_scaling):
    """Pure-JAX reference (mirrors PyTorch train-mode forward, biases included)."""
    h1 = state @ params["w1"] + params["b1"]
    mu1 = h1.mean(0, keepdims=True)
    var1 = ((h1 - mu1) ** 2).mean(0, keepdims=True)
    h1 = jax.nn.relu((h1 - mu1) / jnp.sqrt(var1 + _BN_EPS) * params["gamma1"] + params["beta1"])

    h2 = h1 @ params["w2"] + params["b2"]
    mu2 = h2.mean(0, keepdims=True)
    var2 = ((h2 - mu2) ** 2).mean(0, keepdims=True)
    h2 = jax.nn.relu((h2 - mu2) / jnp.sqrt(var2 + _BN_EPS) * params["gamma2"] + params["beta2"])

    return jnp.tanh(h2 @ params["w3"] + params["b3"]) * action_scaling


def init_params(key, dim_state, actor_node, dim_action):
    """Deterministic synthetic parameters (PyTorch-Linear-style uniform init)."""
    ks = jax.random.split(key, 6)

    def lin_init(kw, kb, fan_in, fan_out):
        bound = 1.0 / jnp.sqrt(jnp.float32(fan_in))
        w = jax.random.uniform(kw, (fan_in, fan_out), jnp.float32, -bound, bound)
        b = jax.random.uniform(kb, (1, fan_out), jnp.float32, -bound, bound)
        return w, b

    w1, b1 = lin_init(ks[0], ks[1], dim_state, actor_node)
    w2, b2 = lin_init(ks[2], ks[3], actor_node, actor_node)
    w3, b3 = lin_init(ks[4], ks[5], actor_node, dim_action)
    return {
        "w1": w1, "b1": b1,
        "gamma1": jnp.ones((1, actor_node), jnp.float32),
        "beta1": jnp.zeros((1, actor_node), jnp.float32),
        "w2": w2, "b2": b2,
        "gamma2": jnp.ones((1, actor_node), jnp.float32),
        "beta2": jnp.zeros((1, actor_node), jnp.float32),
        "w3": w3, "b3": b3,
    }


def _run_case(key, batch, dim_state, actor_node, dim_action, action_scaling):
    k_state, k_params = jax.random.split(key)
    state = jax.random.normal(k_state, (batch, dim_state), jnp.float32)
    params = init_params(k_params, dim_state, actor_node, dim_action)

    slab = pack_actor_params(params, dim_state, actor_node, dim_action)
    out = actor_forward(state, slab, action_scaling,
                        dim_state=dim_state, hidden=actor_node, dim_action=dim_action)
    out = jax.block_until_ready(out)

    ref = _reference_forward(state, params, action_scaling)
    assert out.shape == (batch, dim_action)
    assert jnp.allclose(out, ref, atol=1e-4, rtol=1e-4), \
        f"Pallas output mismatch vs reference (dim_action={dim_action})"


if __name__ == "__main__":
    key = jax.random.PRNGKey(0)
    k1, k2 = jax.random.split(key)

    # Pendulum config: dim_state=3, actor_node=32, dim_action=1, scaling=2.0
    _run_case(k1, batch=8, dim_state=3, actor_node=32, dim_action=1, action_scaling=2.0)

    # Multi-action config to exercise + validate the MXU lin3 path (dim_action > 1).
    _run_case(k2, batch=8, dim_state=5, actor_node=32, dim_action=3, action_scaling=1.5)

    print("KERNEL_OK")
</pallas_src>

<mosaic_0001>
module attributes {stable_mosaic.version = 11 : i64} {
  func.func @actor_kernel(%arg0: memref<8x3xf32, #tpu.memory_space<vmem>>, %arg1: memref<144x128xf32, #tpu.memory_space<vmem>>, %arg2: memref<1x1xf32, #tpu.memory_space<smem>>, %arg3: memref<8x128xf32, #tpu.memory_space<vmem>>) attributes {dimension_semantics = [], scalar_prefetch = 0 : i64, scratch_operands = 0 : i64, tpu.core_type = #tpu.core_type<tc>} {
    %c0 = arith.constant 0 : index
    %c0_0 = arith.constant 0 : index
    %0 = vector.load %arg0[%c0, %c0_0] : memref<8x3xf32, #tpu.memory_space<vmem>>, vector<8x3xf32>
    %c128 = arith.constant 128 : index
    %c0_1 = arith.constant 0 : index
    %1 = vector.load %arg1[%c128, %c0_1] : memref<144x128xf32, #tpu.memory_space<vmem>>, vector<3x128xf32>
    %cst = arith.constant dense<0.000000e+00> : vector<8x128xf32>
    %2 = tpu.matmul %0, %1, %cst {dimension_numbers = #tpu.dot_dimension_numbers<[1], [0], [0], [1], [0, 0, 1, 1], [], []>} : vector<8x3xf32>, vector<3x128xf32>, vector<8x128xf32> -> vector<8x128xf32>
    %c131 = arith.constant 131 : index
    %c0_2 = arith.constant 0 : index
    %3 = vector.load %arg1[%c131, %c0_2] : memref<144x128xf32, #tpu.memory_space<vmem>>, vector<1x128xf32>
    %c132 = arith.constant 132 : index
    %c0_3 = arith.constant 0 : index
    %4 = vector.load %arg1[%c132, %c0_3] : memref<144x128xf32, #tpu.memory_space<vmem>>, vector<1x128xf32>
    %cst_4 = arith.constant dense<0.000000e+00> : vector<128xf32>
    %5 = vector.multi_reduction <add>, %2, %cst_4 [0] : vector<8x128xf32> to vector<128xf32>
    %6 = vector.shape_cast %5 : vector<128xf32> to vector<1x128xf32>
    %cst_5 = arith.constant 8.000000e+00 : f32
    %7 = vector.broadcast %cst_5 : f32 to vector<1x128xf32>
    %8 = arith.divf %6, %7 : vector<1x128xf32>
    %9 = arith.mulf %2, %2 : vector<8x128xf32>
    %cst_6 = arith.constant dense<0.000000e+00> : vector<128xf32>
    %10 = vector.multi_reduction <add>, %9, %cst_6 [0] : vector<8x128xf32> to vector<128xf32>
    %11 = vector.shape_cast %10 : vector<128xf32> to vector<1x128xf32>
    %cst_7 = arith.constant 8.000000e+00 : f32
    %12 = vector.broadcast %cst_7 : f32 to vector<1x128xf32>
    %13 = arith.divf %11, %12 : vector<1x128xf32>
    %14 = arith.mulf %8, %8 : vector<1x128xf32>
    %15 = arith.subf %13, %14 : vector<1x128xf32>
    %cst_8 = arith.constant 0.000000e+00 : f32
    %16 = vector.broadcast %cst_8 : f32 to vector<1x128xf32>
    %17 = arith.maximumf %15, %16 : vector<1x128xf32>
    %18 = vector.broadcast %8 : vector<1x128xf32> to vector<8x128xf32>
    %19 = arith.subf %2, %18 : vector<8x128xf32>
    %cst_9 = arith.constant 9.99999974E-6 : f32
    %20 = vector.broadcast %cst_9 : f32 to vector<1x128xf32>
    %21 = arith.addf %17, %20 : vector<1x128xf32>
    %22 = math.rsqrt %21 : vector<1x128xf32>
    %23 = vector.broadcast %22 : vector<1x128xf32> to vector<8x128xf32>
    %24 = arith.mulf %19, %23 : vector<8x128xf32>
    %25 = vector.broadcast %3 : vector<1x128xf32> to vector<8x128xf32>
    %26 = arith.mulf %24, %25 : vector<8x128xf32>
    %27 = vector.broadcast %4 : vector<1x128xf32> to vector<8x128xf32>
    %28 = arith.addf %26, %27 : vector<8x128xf32>
    %cst_10 = arith.constant 0.000000e+00 : f32
    %29 = vector.broadcast %cst_10 : f32 to vector<8x128xf32>
    %30 = arith.maximumf %28, %29 : vector<8x128xf32>
    %c0_11 = arith.constant 0 : index
    %c0_12 = arith.constant 0 : index
    %31 = vector.load %arg1[%c0_11, %c0_12] : memref<144x128xf32, #tpu.memory_space<vmem>>, vector<128x128xf32>
    %cst_13 = arith.constant dense<0.000000e+00> : vector<8x128xf32>
    %32 = tpu.matmul %30, %31, %cst_13 {dimension_numbers = #tpu.dot_dimension_numbers<[1], [0], [0], [1], [0, 0, 1, 1], [], []>} : vector<8x128xf32>, vector<128x128xf32>, vector<8x128xf32> -> vector<8x128xf32>
    %c133 = arith.constant 133 : index
    %c0_14 = arith.constant 0 : index
    %33 = vector.load %arg1[%c133, %c0_14] : memref<144x128xf32, #tpu.memory_space<vmem>>, vector<1x128xf32>
    %c134 = arith.constant 134 : index
    %c0_15 = arith.constant 0 : index
    %34 = vector.load %arg1[%c134, %c0_15] : memref<144x128xf32, #tpu.memory_space<vmem>>, vector<1x128xf32>
    %cst_16 = arith.constant dense<0.000000e+00> : vector<128xf32>
    %35 = vector.multi_reduction <add>, %32, %cst_16 [0] : vector<8x128xf32> to vector<128xf32>
    %36 = vector.shape_cast %35 : vector<128xf32> to vector<1x128xf32>
    %cst_17 = arith.constant 8.000000e+00 : f32
    %37 = vector.broadcast %cst_17 : f32 to vector<1x128xf32>
    %38 = arith.divf %36, %37 : vector<1x128xf32>
    %39 = arith.mulf %32, %32 : vector<8x128xf32>
    %cst_18 = arith.constant dense<0.000000e+00> : vector<128xf32>
    %40 = vector.multi_reduction <add>, %39, %cst_18 [0] : vector<8x128xf32> to vector<128xf32>
    %41 = vector.shape_cast %40 : vector<128xf32> to vector<1x128xf32>
    %cst_19 = arith.constant 8.000000e+00 : f32
    %42 = vector.broadcast %cst_19 : f32 to vector<1x128xf32>
    %43 = arith.divf %41, %42 : vector<1x128xf32>
    %44 = arith.mulf %38, %38 : vector<1x128xf32>
    %45 = arith.subf %43, %44 : vector<1x128xf32>
    %cst_20 = arith.constant 0.000000e+00 : f32
    %46 = vector.broadcast %cst_20 : f32 to vector<1x128xf32>
    %47 = arith.maximumf %45, %46 : vector<1x128xf32>
    %48 = vector.broadcast %38 : vector<1x128xf32> to vector<8x128xf32>
    %49 = arith.subf %32, %48 : vector<8x128xf32>
    %cst_21 = arith.constant 9.99999974E-6 : f32
    %50 = vector.broadcast %cst_21 : f32 to vector<1x128xf32>
    %51 = arith.addf %47, %50 : vector<1x128xf32>
    %52 = math.rsqrt %51 : vector<1x128xf32>
    %53 = vector.broadcast %52 : vector<1x128xf32> to vector<8x128xf32>
    %54 = arith.mulf %49, %53 : vector<8x128xf32>
    %55 = vector.broadcast %33 : vector<1x128xf32> to vector<8x128xf32>
    %56 = arith.mulf %54, %55 : vector<8x128xf32>
    %57 = vector.broadcast %34 : vector<1x128xf32> to vector<8x128xf32>
    %58 = arith.addf %56, %57 : vector<8x128xf32>
    %cst_22 = arith.constant 0.000000e+00 : f32
    %59 = vector.broadcast %cst_22 : f32 to vector<8x128xf32>
    %60 = arith.maximumf %58, %59 : vector<8x128xf32>
    %c0_23 = arith.constant 0 : index
    %c0_24 = arith.constant 0 : index
    %61 = memref.load %arg2[%c0_23, %c0_24] : memref<1x1xf32, #tpu.memory_space<smem>>
    %c136 = arith.constant 136 : index
    %c0_25 = arith.constant 0 : index
    %62 = vector.load %arg1[%c136, %c0_25] : memref<144x128xf32, #tpu.memory_space<vmem>>, vector<1x128xf32>
    %c135 = arith.constant 135 : index
    %c0_26 = arith.constant 0 : index
    %63 = vector.load %arg1[%c135, %c0_26] : memref<144x128xf32, #tpu.memory_space<vmem>>, vector<1x128xf32>
    %64 = vector.broadcast %63 : vector<1x128xf32> to vector<8x128xf32>
    %65 = arith.mulf %60, %64 : vector<8x128xf32>
    %cst_27 = arith.constant dense<0.000000e+00> : vector<8xf32>
    %66 = vector.multi_reduction <add>, %65, %cst_27 [1] : vector<8x128xf32> to vector<8xf32>
    %67 = vector.shape_cast %66 : vector<8xf32> to vector<8x1xf32>
    %68 = vector.extract_strided_slice %62 {offsets = [0, 0], sizes = [1, 1], strides = [1, 1]} : vector<1x128xf32> to vector<1x1xf32>
    %69 = vector.broadcast %68 : vector<1x1xf32> to vector<8x1xf32>
    %70 = arith.addf %67, %69 : vector<8x1xf32>
    %71 = math.tanh %70 : vector<8x1xf32>
    %72 = vector.broadcast %61 : f32 to vector<8x1xf32>
    %73 = arith.mulf %71, %72 : vector<8x1xf32>
    %74 = vector.shape_cast %73 : vector<8x1xf32> to vector<8x1xf32>
    %75 = vector.broadcast %74 : vector<8x1xf32> to vector<8x128xf32>
    %c0_28 = arith.constant 0 : index
    %c0_29 = arith.constant 0 : index
    %76 = vector.load %arg3[%c0_28, %c0_29] : memref<8x128xf32, #tpu.memory_space<vmem>>, vector<8x128xf32>
    tpu.vector_store %arg3[%c0_28, %c0_29], %75 {strides = array<i32>} : memref<8x128xf32, #tpu.memory_space<vmem>>, vector<8x128xf32>,
    return
  }
}

</mosaic_0001>

<bundles_post_ra>
// kernel: actor_forward.1
= control target key start
LH: loop header
LB: loop body
LE: loop exit
PB: predicated region body
PF: predicated region fallthrough
CT: control target
= control target key end

     0   :  { %9 = vsyncpa [#allocation4], 0  ;;  %s397_s12 = smov [#allocation3]   ;;  %s435_s0 = inlined_call_operand.vmem [shape: f32[8,3], index: 0, kind: input, shape index: {}]   ;;  %s436_s1 = inlined_call_operand.hbm [shape: f32[144,128], index: 1, kind: input, shape index: {}]   ;;  %s437_s2 = inlined_call_operand.<no memory space> [shape: f32[1,1], index: 2, kind: input, shape index: {}]   ;;  %s438_s3 = inlined_call_operand.vmem [shape: f32[8,128], index: 3, kind: output, shape index: {}]  }
   0x1   :  { %s17_s13 = sshll.u32 %s397_s12, 4  ;;  %s18_s13 = int_to_ptr.vmem [resolvable:$true] %s17_s13 }
   0x2   :  { %s383_s14 = scalar_lea.vmem %s18_s13, 2304  ;;  %p388_p1 = scmp.lt.s32.totalorder %s18_s13, %s18_s13 }
   0x3   :  { %p384_p0 = scmp.ne.s32.totalorder %s18_s13, %s383_s14  ;;  %p389_p2 = scmp.lt.s32.totalorder %s383_s14, %s383_s14 }
   0x5   :  { %p390_p3 = por %p389_p2, %p388_p1 }
   0x7   :  { %p391_p4 = pnand %p390_p3, %p384_p0 }
   0x9   :  { %394 = shalt.err (!%p391_p4)
}
   0xa   :  { %s398_s15 = smov 128   ;;  %s399_s16 = smov 8  }
   0xb   :  { %23 = dma.hbm_to_vmem [thread:$0]  %s436_s1, 2304, %s18_s13, [#allocation4], %s398_s15, %s398_s15, %s399_s16  }
   0xc   :  { %395 = dma.done.wait [#allocation4], 2304  }
   0xd   :  { %396 = vsyncadd [#allocation4], 4294964992  ;;  %v400_v0 = vmov 0.0   ;;  %vm401_vm0 = vmmov 0   ;;  %vm35_vm1 = vcmask 1042432   ;;  %vm31_vm2 = vcmask 23552  }
   0xe   :  { %322 = vmatprep.subr.mxu0 %v400_v0  ;;  %324 = vmatprep.mubr.msk.f32.mxu0 %vm401_vm0, %v400_v0  ;;  %v30_v1 = vld [vmem:[#allocation3 + $0x80] sm:$0x7]  ;;  %v160_v3 = vld [vmem:[#allocation3 + $0x78] sm:$0xff]  ;;  %v159_v4 = vld [vmem:[#allocation3 + $0x70] sm:$0xff] }
   0xf   :  { %327 = vmatprep.subr.mxu1 %v400_v0  ;;  %359 = vmatprep.mubr.msk.f32.mxu1 %vm401_vm0, %v400_v0  ;;  %v29_v2 = vld [vmem:[%s435_s0] sm:$0xff]  ;;  %v158_v5 = vld [vmem:[#allocation3 + $0x68] sm:$0xff]  ;;  %v156_v7 = vld [vmem:[#allocation3 + $0x58] sm:$0xff] }
  0x10   :  { %323 = vmatpush3.msk.msra.mxu0 %vm35_vm1, %v30_v1  ;;  %328 = vmatpush3.msra.mxu1 %v160_v3  ;;  %v157_v6 = vld [vmem:[#allocation3 + $0x60] sm:$0xff]  ;;  %v155_v8 = vld [vmem:[#allocation3 + $0x50] sm:$0xff]  ;;  %v154_v9 = vld [vmem:[#allocation3 + $0x48] sm:$0xff] }
  0x11   :  { %325 = vmatmul.mubr.msk.f32.vlgmr.msra.gmra.mxu0 %vm31_vm2, %v29_v2  ;;  %329 = vmatprep.subr.mxu1 %v400_v0  ;;  %v153_v10 = vld [vmem:[#allocation3 + $0x40] sm:$0xff]  ;;  %v152_v11 = vld [vmem:[#allocation3 + $0x38] sm:$0xff]  ;;  %v151_v12 = vld [vmem:[#allocation3 + $0x30] sm:$0xff] }
  0x12   :  { %330 = vmatpush3.msra.mxu1 %v159_v4  ;;  %v150_v13 = vld [vmem:[#allocation3 + $0x28] sm:$0xff]  ;;  %v149_v14 = vld [vmem:[#allocation3 + $0x20] sm:$0xff]  ;;  %v148_v15 = vld [vmem:[#allocation3 + $0x18] sm:$0xff] }
  0x13   :  { %331 = vmatprep.subr.mxu1 %v400_v0  ;;  %v147_v16 = vld [vmem:[#allocation3 + $0x10] sm:$0xff]  ;;  %v146_v17 = vld [vmem:[#allocation3 + $0x8] sm:$0xff]  ;;  %v145_v18 = vld [vmem:[#allocation3] sm:$0xff] }
  0x14   :  { %332 = vmatpush3.msra.mxu1 %v158_v5  ;;  %v297_v42 = vld [vmem:[#allocation3 + $0x83] ss:$0 sm:$0xff]  ;;  %v298_v44 = vld [vmem:[#allocation3 + $0x84] ss:$0 sm:$0xff] }
  0x15   :  { %333 = vmatprep.subr.mxu1 %v400_v0 }
  0x16   :  { %334 = vmatpush3.msra.mxu1 %v157_v6 }
  0x17   :  { %335 = vmatprep.subr.mxu1 %v400_v0 }
  0x18   :  { %336 = vmatpush3.msra.mxu1 %v156_v7  ;;  %v299_v7 = vld [vmem:[#allocation3 + $0x85] ss:$0 sm:$0xff] }
  0x19   :  { %337 = vmatprep.subr.mxu1 %v400_v0 }
  0x1a   :  { %338 = vmatpush3.msra.mxu1 %v155_v8 }
  0x1b   :  { %339 = vmatprep.subr.mxu1 %v400_v0 }
  0x1c   :  { %340 = vmatpush3.msra.mxu1 %v154_v9  ;;  %v300_v9 = vld [vmem:[#allocation3 + $0x86] ss:$0 sm:$0xff] }
  0x1d   :  { %341 = vmatprep.subr.mxu1 %v400_v0 }
  0x1e   :  { %342 = vmatpush3.msra.mxu1 %v153_v10 }
  0x1f   :  { %343 = vmatprep.subr.mxu1 %v400_v0 }
  0x20   :  { %344 = vmatpush3.msra.mxu1 %v152_v11 }
  0x21   :  { %345 = vmatprep.subr.mxu1 %v400_v0 }
  0x22   :  { %346 = vmatpush3.msra.mxu1 %v151_v12  ;;  %v301_v12 = vld [vmem:[#allocation3 + $0x87] ss:$0 sm:$0xff] }
  0x23   :  { %347 = vmatprep.subr.mxu1 %v400_v0 }
  0x24   :  { %348 = vmatpush3.msra.mxu1 %v150_v13 }
  0x25   :  { %349 = vmatprep.subr.mxu1 %v400_v0 }
  0x26   :  { %350 = vmatpush3.msra.mxu1 %v149_v14 }
  0x27   :  { %351 = vmatprep.subr.mxu1 %v400_v0 }
  0x28   :  { %352 = vmatpush3.msra.mxu1 %v148_v15  ;;  %v402_v15 = vmov 0  }
  0x29   :  { %353 = vmatprep.subr.mxu1 %v400_v0  ;;  %368 = vset.pattern.permute.xlu0 %v402_v15 }
  0x2a   :  { %354 = vmatpush3.msra.mxu1 %v147_v16  ;;  %v302_v16 = vld [vmem:[#allocation3 + $0x88] ss:$0 sm:$0xff] }
  0x2b   :  { %355 = vmatprep.subr.mxu1 %v400_v0 }
  0x2c   :  { %356 = vmatpush3.msra.mxu1 %v146_v17 }
  0x2d   :  { %357 = vmatprep.subr.mxu1 %v400_v0 }
  0x2e   :  { %358 = vmatpush3.msra.mxu1 %v145_v18 }
  0xd1   :  { %v105_v19 = vpop.f32.mrf.mxu0 }
  0xd2   :  { %v111_v20 = vrot.slane %v105_v19, 4  ;;  %v119_v21 = vmul.f32 %v105_v19, %v105_v19 }
  0xd3   :  { %v326_v22 = vpop.f32.mrf.mxu0 }
  0xd4   :  { %v112_v23 = vadd.f32 %v111_v20, %v105_v19  ;;  %v120_v24 = vrot.slane %v119_v21, 4 }
  0xd6   :  { %v113_v25 = vrot.slane %v112_v23, 2  ;;  %v121_v26 = vadd.f32 %v120_v24, %v119_v21 }
  0xd8   :  { %v114_v27 = vadd.f32 %v113_v25, %v112_v23  ;;  %v122_v28 = vrot.slane %v121_v26, 2 }
  0xda   :  { %v115_v29 = vrot.slane %v114_v27, 1  ;;  %v123_v30 = vadd.f32 %v122_v28, %v121_v26 }
  0xdc   :  { %v116_v31 = vadd.f32 %v115_v29, %v114_v27  ;;  %v124_v32 = vrot.slane %v123_v30, 1 }
  0xde   :  { %v118_v33 = vmul.f32 0.125, %v116_v31  ;;  %v125_v34 = vadd.f32 %v124_v32, %v123_v30 }
  0xe0   :  { %v126_v35 = vmul.f32 0.125, %v125_v34  ;;  %v127_v36 = vmul.f32 %v118_v33, %v118_v33  ;;  %v130_v40 = vsub.f32 %v105_v19, %v118_v33  ;;  %v282_v19 = vstv %s437_s2 }
  0xe2   :  { %v128_v37 = vsub.f32 %v126_v35, %v127_v36 }
  0xe4   :  { %v129_v38 = vmax.f32 %v128_v37, 0.0 }
  0xe6   :  { %v131_v39 = vadd.f32 1e-05, %v129_v38 }
  0xe8   :  { %369 = vrsqrt.f32 %v131_v39 }
  0xf5   :  { %v370_v41 = vpop.eup %369 }
  0xf6   :  { %v133_v43 = vmul.f32 %v370_v41, %v130_v40 }
  0xf8   :  { %v138_v45 = vmul.f32 %v297_v42, %v133_v43 }
  0xfa   :  { %v143_v46 = vadd.f32 %v298_v44, %v138_v45 }
  0xfc   :  { %v144_v47 = vmax.f32 %v143_v46, 0.0 }
  0xfe   :  { %360 = vmatmul.mubr.f32.vlgmr.msra.gmra.mxu1 %v144_v47 }
 0x1be   :  { %v227_v48 = vpop.f32.mrf.mxu1 }
 0x1bf   :  { %v233_v49 = vrot.slane %v227_v48, 4  ;;  %v240_v50 = vmul.f32 %v227_v48, %v227_v48 }
 0x1c0   :  { %v361_v51 = vpop.f32.mrf.mxu1 }
 0x1c1   :  { %v234_v52 = vadd.f32 %v233_v49, %v227_v48  ;;  %v241_v53 = vrot.slane %v240_v50, 4 }
 0x1c3   :  { %v235_v54 = vrot.slane %v234_v52, 2  ;;  %v242_v55 = vadd.f32 %v241_v53, %v240_v50 }
 0x1c5   :  { %v236_v56 = vadd.f32 %v235_v54, %v234_v52  ;;  %v243_v57 = vrot.slane %v242_v55, 2 }
 0x1c7   :  { %v237_v58 = vrot.slane %v236_v56, 1  ;;  %v244_v59 = vadd.f32 %v243_v57, %v242_v55 }
 0x1c9   :  { %v238_v60 = vadd.f32 %v237_v58, %v236_v56  ;;  %v245_v61 = vrot.slane %v244_v59, 1 }
 0x1cb   :  { %v239_v62 = vmul.f32 0.125, %v238_v60  ;;  %v246_v63 = vadd.f32 %v245_v61, %v244_v59 }
 0x1cd   :  { %v247_v0 = vmul.f32 0.125, %v246_v63  ;;  %v248_v1 = vmul.f32 %v239_v62, %v239_v62  ;;  %v251_v5 = vsub.f32 %v227_v48, %v239_v62 }
 0x1cf   :  { %v249_v2 = vsub.f32 %v247_v0, %v248_v1 }
 0x1d1   :  { %v250_v3 = vmax.f32 %v249_v2, 0.0 }
 0x1d3   :  { %v252_v4 = vadd.f32 1e-05, %v250_v3 }
 0x1d5   :  { %371 = vrsqrt.f32 %v252_v4 }
 0x1e2   :  { %v372_v6 = vpop.eup %371 }
 0x1e3   :  { %v254_v8 = vmul.f32 %v372_v6, %v251_v5 }
 0x1e5   :  { %v259_v10 = vmul.f32 %v299_v7, %v254_v8 }
 0x1e7   :  { %v264_v11 = vadd.f32 %v300_v9, %v259_v10 }
 0x1e9   :  { %v265_v13 = vmax.f32 %v264_v11, 0.0 }
 0x1eb   :  { %v273_v14 = vmul.f32 %v301_v12, %v265_v13 }
 0x1ed   :  { %274 = vadd.xlane.f32.xlu0 %v273_v14 }
 0x276   :  { %v275_v17 = vpop.xlane.xlu0 %274 }
 0x277   :  { %v280_v18 = vadd.f32 %v302_v16, %v275_v17 }
 0x279   :  { %373 = vtanh.f32 %v280_v18 }
 0x286   :  { %v374_v20 = vpop.eup %373 }
 0x287   :  { %v283_v21 = vmul.f32 %v374_v20, %v282_v19 }
 0x289   :  { %286 = vperm.xlu0 %368, %v283_v21  }
 0x304   :  { %v287_v22 = vpop.permute.xlu0 %286 }
 0x305   :  { %289 = vst [vmem:[%s438_s3] sm:$0xff] %v287_v22 }
 0x306   :  { %294 = vsyncpa [#allocation4], 1 }

</bundles_post_ra>
